<compile_context>
chip_gen: v7x
topology: tpu7x:2x2x1
jax: 0.10.0
libtpu: 0.0.40
codegen_flags: <defaults>
</compile_context>

<pallas_src>
import jax
import jax.numpy as jnp
import numpy as np
from jax.experimental import pallas as pl
from jax.experimental.pallas import tpu as pltpu

INPUT_SIZE = 16
LSTM_SIZE = 32
HID1 = 40
OUT = 96
BATCH = 2
SEQ_LEN = 8

H = LSTM_SIZE
IN_H = INPUT_SIZE + LSTM_SIZE        # 48: packed [x ; h] width
PAD = 128                            # lane width; 4*H == 128 too
W_ROWS = IN_H + LSTM_SIZE + PAD      # 48 + 32 + 128 = 208 rows in the weight slab


# ---------------------------------------------------------------------------
# Single-step kernel (matches LSTM_MLP.forward exactly).
# ---------------------------------------------------------------------------
def lstm_mlp_step_kernel(xh_ref, c_ref, w_ref, b_ref,
                         out_ref, h_out_ref, c_out_ref):
    xh = xh_ref[...]                                   # (B, 48) = [x ; h]
    c = c_ref[...]                                     # (B, 32)

    # Static, sublane-aligned slices of the packed slabs.
    w_gates = w_ref[0:IN_H, :]                         # (48, 128) = [W_ih^T ; W_hh^T]
    w1 = w_ref[IN_H:IN_H + H, :]                       # (32, 128) Linear(H,40) zero-padded
    w2 = w_ref[IN_H + H:W_ROWS, :]                     # (128,128) Linear(40,96) zero-padded
    b_gates = b_ref[0:1, :]                            # b_ih + b_hh folded
    b1 = b_ref[1:2, :]
    b2 = b_ref[2:3, :]

    # Fused gate matmul: single MXU pass over the packed input.
    gates = jnp.dot(xh, w_gates, preferred_element_type=jnp.float32) + b_gates

    # One sigmoid over the full 128-lane vreg, then slice; tanh only on g.
    sig = jax.nn.sigmoid(gates)
    i_g = sig[:, 0 * H:1 * H]
    f_g = sig[:, 1 * H:2 * H]
    o_g = sig[:, 3 * H:4 * H]
    g_g = jnp.tanh(gates[:, 2 * H:3 * H])

    c_next = f_g * c + i_g * g_g
    h_next = o_g * jnp.tanh(c_next)
    h_out_ref[...] = h_next
    c_out_ref[...] = c_next

    # MLP head, lane-dense (padded to 128; padding is zero so ReLU is inert).
    a1 = jnp.maximum(h_next, 0.0)
    z1 = jnp.maximum(jnp.dot(a1, w1, preferred_element_type=jnp.float32) + b1, 0.0)
    out_ref[...] = jnp.dot(z1, w2, preferred_element_type=jnp.float32) + b2


def lstm_mlp_forward(x, h, c, packed):
    """x: [B, 16], h/c: [B, 32]; returns (out[B,96], h_next, c_next)."""
    B = x.shape[0]
    w_all, b_all = packed
    xh = jnp.concatenate([x, h], axis=1)               # pack once in the wrapper

    vmem = pl.BlockSpec(memory_space=pltpu.MemorySpace.VMEM)
    out_pad, h_next, c_next = pl.pallas_call(
        lstm_mlp_step_kernel,
        out_shape=(
            jax.ShapeDtypeStruct((B, PAD), jnp.float32),
            jax.ShapeDtypeStruct((B, LSTM_SIZE), jnp.float32),
            jax.ShapeDtypeStruct((B, LSTM_SIZE), jnp.float32),
        ),
        in_specs=[vmem] * 4,
        out_specs=(vmem, vmem, vmem),
    )(xh, c, w_all, b_all)
    return out_pad[:, :OUT], h_next, c_next


# ---------------------------------------------------------------------------
# Sequence-fused kernel: whole recurrence in ONE pallas_call, grid=(T,).
# Weights stay resident in VMEM (constant index_map), h/c carried in scratch.
# ---------------------------------------------------------------------------
def lstm_mlp_seq_kernel(x_ref, w_ref, b_ref,
                        out_ref, h_out_ref, c_out_ref,
                        h_sc, c_sc):
    t = pl.program_id(0)

    @pl.when(t == 0)
    def _():
        h_sc[...] = jnp.zeros_like(h_sc)               # h_cur = c_cur = None -> zeros
        c_sc[...] = jnp.zeros_like(c_sc)

    x = x_ref[0]                                       # (B, 16)
    h = h_sc[...]
    c = c_sc[...]

    w_ih = w_ref[0:INPUT_SIZE, :]                      # (16, 128)
    w_hh = w_ref[INPUT_SIZE:IN_H, :]                   # (32, 128)
    w1 = w_ref[IN_H:IN_H + H, :]
    w2 = w_ref[IN_H + H:W_ROWS, :]
    b_gates = b_ref[0:1, :]
    b1 = b_ref[1:2, :]
    b2 = b_ref[2:3, :]

    gates = (jnp.dot(x, w_ih, preferred_element_type=jnp.float32)
             + jnp.dot(h, w_hh, preferred_element_type=jnp.float32)
             + b_gates)
    sig = jax.nn.sigmoid(gates)
    i_g = sig[:, 0 * H:1 * H]
    f_g = sig[:, 1 * H:2 * H]
    o_g = sig[:, 3 * H:4 * H]
    g_g = jnp.tanh(gates[:, 2 * H:3 * H])

    c_next = f_g * c + i_g * g_g
    h_next = o_g * jnp.tanh(c_next)
    h_sc[...] = h_next
    c_sc[...] = c_next
    h_out_ref[...] = h_next
    c_out_ref[...] = c_next

    a1 = jnp.maximum(h_next, 0.0)
    z1 = jnp.maximum(jnp.dot(a1, w1, preferred_element_type=jnp.float32) + b1, 0.0)
    out_ref[0] = jnp.dot(z1, w2, preferred_element_type=jnp.float32) + b2


def lstm_mlp_sequence(x_seq, packed):
    """x_seq: [T, B, 16]; returns (out_seq[T,B,96], h_last, c_last), zero init."""
    T, B, _ = x_seq.shape
    w_all, b_all = packed
    out_seq, h_last, c_last = pl.pallas_call(
        lstm_mlp_seq_kernel,
        out_shape=(
            jax.ShapeDtypeStruct((T, B, PAD), jnp.float32),
            jax.ShapeDtypeStruct((B, LSTM_SIZE), jnp.float32),
            jax.ShapeDtypeStruct((B, LSTM_SIZE), jnp.float32),
        ),
        grid=(T,),
        in_specs=[
            pl.BlockSpec((1, B, INPUT_SIZE), lambda t: (t, 0, 0)),
            pl.BlockSpec((W_ROWS, PAD), lambda t: (0, 0)),   # weights resident
            pl.BlockSpec((3, PAD), lambda t: (0, 0)),        # biases resident
        ],
        out_specs=(
            pl.BlockSpec((1, B, PAD), lambda t: (t, 0, 0)),
            pl.BlockSpec((B, LSTM_SIZE), lambda t: (0, 0)),
            pl.BlockSpec((B, LSTM_SIZE), lambda t: (0, 0)),
        ),
        scratch_shapes=[
            pltpu.VMEM((B, LSTM_SIZE), jnp.float32),         # h carry
            pltpu.VMEM((B, LSTM_SIZE), jnp.float32),         # c carry
        ],
        compiler_params=pltpu.CompilerParams(
            dimension_semantics=("arbitrary",)),             # recurrence axis
    )(x_seq, w_all, b_all)
    return out_seq[:, :, :OUT], h_last, c_last


# ---------------------------------------------------------------------------
# Parameters (PyTorch shapes) + packing into the two VMEM slabs.
# ---------------------------------------------------------------------------
def init_params(key):
    ks = jax.random.split(key, 8)

    def u(k, shape, b):
        return jax.random.uniform(k, shape, jnp.float32, -b, b)

    bound = 1.0 / np.sqrt(LSTM_SIZE)
    w_ih = u(ks[0], (4 * LSTM_SIZE, INPUT_SIZE), bound)
    w_hh = u(ks[1], (4 * LSTM_SIZE, LSTM_SIZE), bound)
    b_ih = u(ks[2], (4 * LSTM_SIZE,), bound)
    b_hh = u(ks[3], (4 * LSTM_SIZE,), bound)
    b1w = 1.0 / np.sqrt(LSTM_SIZE)
    w1 = u(ks[4], (HID1, LSTM_SIZE), b1w)
    b1 = u(ks[5], (HID1,), b1w)
    b2w = 1.0 / np.sqrt(HID1)
    w2 = u(ks[6], (OUT, HID1), b2w)
    b2 = u(ks[7], (OUT,), b2w)
    return (w_ih, w_hh, b_ih, b_hh, w1, b1, w2, b2)


def pack_params(raw):
    w_ih, w_hh, b_ih, b_hh, w1, b1, w2, b2 = raw
    w_gates = jnp.concatenate([w_ih.T, w_hh.T], axis=0)                        # (48, 128)
    b_gates = (b_ih + b_hh)[None, :]                                           # (1, 128)
    w1_pad = jnp.zeros((LSTM_SIZE, PAD), jnp.float32).at[:, :HID1].set(w1.T)   # (32, 128)
    b1_pad = jnp.zeros((1, PAD), jnp.float32).at[0, :HID1].set(b1)
    w2_pad = jnp.zeros((PAD, PAD), jnp.float32).at[:HID1, :OUT].set(w2.T)      # (128, 128)
    b2_pad = jnp.zeros((1, PAD), jnp.float32).at[0, :OUT].set(b2)
    w_all = jnp.concatenate([w_gates, w1_pad, w2_pad], axis=0)                 # (208, 128)
    b_all = jnp.concatenate([b_gates, b1_pad, b2_pad], axis=0)                 # (3, 128)
    return (w_all, b_all)


def reference_step(x, h, c, raw):
    """Pure-JAX reference mirroring the PyTorch module exactly."""
    w_ih, w_hh, b_ih, b_hh, w1, b1, w2, b2 = raw
    gates = x @ w_ih.T + h @ w_hh.T + b_ih + b_hh
    i = jax.nn.sigmoid(gates[:, 0 * H:1 * H])
    f = jax.nn.sigmoid(gates[:, 1 * H:2 * H])
    g = jnp.tanh(gates[:, 2 * H:3 * H])
    o = jax.nn.sigmoid(gates[:, 3 * H:4 * H])
    c_next = f * c + i * g
    h_next = o * jnp.tanh(c_next)
    a1 = jnp.maximum(h_next, 0.0)
    z1 = jnp.maximum(a1 @ w1.T + b1, 0.0)
    out = z1 @ w2.T + b2
    return out, h_next, c_next


if __name__ == "__main__":
    key = jax.random.PRNGKey(0)
    kx, ks, kp = jax.random.split(key, 3)

    raw = init_params(kp)
    packed = pack_params(raw)

    # ---- single-step forward (matches LSTM_MLP.forward, h_cur=c_cur=None) ----
    x = jax.random.normal(kx, (BATCH, INPUT_SIZE), jnp.float32)
    h0 = jnp.zeros((BATCH, LSTM_SIZE), jnp.float32)
    c0 = jnp.zeros((BATCH, LSTM_SIZE), jnp.float32)

    out, h1, c1 = lstm_mlp_forward(x, h0, c0, packed)
    jax.block_until_ready((out, h1, c1))

    out_r, h_r, c_r = reference_step(x, h0, c0, raw)
    assert out.shape == (BATCH, OUT)
    np.testing.assert_allclose(np.asarray(out), np.asarray(out_r), rtol=1e-5, atol=1e-5)
    np.testing.assert_allclose(np.asarray(h1), np.asarray(h_r), rtol=1e-5, atol=1e-5)
    np.testing.assert_allclose(np.asarray(c1), np.asarray(c_r), rtol=1e-5, atol=1e-5)

    # ---- sequence-fused variant: whole recurrence in one pallas_call ----
    x_seq = jax.random.normal(ks, (SEQ_LEN, BATCH, INPUT_SIZE), jnp.float32)
    out_seq, h_last, c_last = lstm_mlp_sequence(x_seq, packed)
    jax.block_until_ready((out_seq, h_last, c_last))

    hr = jnp.zeros((BATCH, LSTM_SIZE), jnp.float32)
    cr = jnp.zeros((BATCH, LSTM_SIZE), jnp.float32)
    outs = []
    for t in range(SEQ_LEN):
        o_t, hr, cr = reference_step(x_seq[t], hr, cr, raw)
        outs.append(o_t)
    out_seq_ref = jnp.stack(outs, axis=0)
    np.testing.assert_allclose(np.asarray(out_seq), np.asarray(out_seq_ref), rtol=1e-5, atol=1e-5)
    np.testing.assert_allclose(np.asarray(h_last), np.asarray(hr), rtol=1e-5, atol=1e-5)
    np.testing.assert_allclose(np.asarray(c_last), np.asarray(cr), rtol=1e-5, atol=1e-5)

    print("KERNEL_OK")
</pallas_src>

<mosaic_0001>
module attributes {stable_mosaic.version = 11 : i64} {
  func.func @lstm_mlp_step_kernel(%arg0: memref<2x48xf32, #tpu.memory_space<vmem>>, %arg1: memref<2x32xf32, #tpu.memory_space<vmem>>, %arg2: memref<208x128xf32, #tpu.memory_space<vmem>>, %arg3: memref<3x128xf32, #tpu.memory_space<vmem>>, %arg4: memref<2x128xf32, #tpu.memory_space<vmem>>, %arg5: memref<2x32xf32, #tpu.memory_space<vmem>>, %arg6: memref<2x32xf32, #tpu.memory_space<vmem>>) attributes {dimension_semantics = [], scalar_prefetch = 0 : i64, scratch_operands = 0 : i64, tpu.core_type = #tpu.core_type<tc>} {
    %c0 = arith.constant 0 : index
    %c0_0 = arith.constant 0 : index
    %0 = vector.load %arg0[%c0, %c0_0] : memref<2x48xf32, #tpu.memory_space<vmem>>, vector<2x48xf32>
    %c0_1 = arith.constant 0 : index
    %c0_2 = arith.constant 0 : index
    %1 = vector.load %arg1[%c0_1, %c0_2] : memref<2x32xf32, #tpu.memory_space<vmem>>, vector<2x32xf32>
    %c0_3 = arith.constant 0 : index
    %c0_4 = arith.constant 0 : index
    %2 = vector.load %arg2[%c0_3, %c0_4] : memref<208x128xf32, #tpu.memory_space<vmem>>, vector<48x128xf32>
    %c48 = arith.constant 48 : index
    %c0_5 = arith.constant 0 : index
    %3 = vector.load %arg2[%c48, %c0_5] : memref<208x128xf32, #tpu.memory_space<vmem>>, vector<32x128xf32>
    %c80 = arith.constant 80 : index
    %c0_6 = arith.constant 0 : index
    %4 = vector.load %arg2[%c80, %c0_6] : memref<208x128xf32, #tpu.memory_space<vmem>>, vector<128x128xf32>
    %c0_7 = arith.constant 0 : index
    %c0_8 = arith.constant 0 : index
    %5 = vector.load %arg3[%c0_7, %c0_8] : memref<3x128xf32, #tpu.memory_space<vmem>>, vector<1x128xf32>
    %c1 = arith.constant 1 : index
    %c0_9 = arith.constant 0 : index
    %6 = vector.load %arg3[%c1, %c0_9] : memref<3x128xf32, #tpu.memory_space<vmem>>, vector<1x128xf32>
    %c2 = arith.constant 2 : index
    %c0_10 = arith.constant 0 : index
    %7 = vector.load %arg3[%c2, %c0_10] : memref<3x128xf32, #tpu.memory_space<vmem>>, vector<1x128xf32>
    %cst = arith.constant dense<0.000000e+00> : vector<2x128xf32>
    %8 = tpu.matmul %0, %2, %cst {dimension_numbers = #tpu.dot_dimension_numbers<[1], [0], [0], [1], [0, 0, 1, 1], [], []>} : vector<2x48xf32>, vector<48x128xf32>, vector<2x128xf32> -> vector<2x128xf32>
    %9 = vector.broadcast %5 : vector<1x128xf32> to vector<2x128xf32>
    %10 = arith.addf %8, %9 : vector<2x128xf32>
    %11 = arith.negf %10 : vector<2x128xf32>
    %12 = math.exp %11 : vector<2x128xf32>
    %cst_11 = arith.constant 1.000000e+00 : f32
    %13 = vector.broadcast %cst_11 : f32 to vector<2x128xf32>
    %14 = arith.addf %13, %12 : vector<2x128xf32>
    %15 = arith.divf %13, %14 : vector<2x128xf32>
    %16 = vector.extract_strided_slice %15 {offsets = [0, 0], sizes = [2, 32], strides = [1, 1]} : vector<2x128xf32> to vector<2x32xf32>
    %17 = vector.extract_strided_slice %15 {offsets = [0, 32], sizes = [2, 32], strides = [1, 1]} : vector<2x128xf32> to vector<2x32xf32>
    %18 = vector.extract_strided_slice %15 {offsets = [0, 96], sizes = [2, 32], strides = [1, 1]} : vector<2x128xf32> to vector<2x32xf32>
    %19 = vector.extract_strided_slice %10 {offsets = [0, 64], sizes = [2, 32], strides = [1, 1]} : vector<2x128xf32> to vector<2x32xf32>
    %20 = math.tanh %19 : vector<2x32xf32>
    %21 = arith.mulf %17, %1 : vector<2x32xf32>
    %22 = arith.mulf %16, %20 : vector<2x32xf32>
    %23 = arith.addf %21, %22 : vector<2x32xf32>
    %24 = math.tanh %23 : vector<2x32xf32>
    %25 = arith.mulf %18, %24 : vector<2x32xf32>
    %c0_12 = arith.constant 0 : index
    %c0_13 = arith.constant 0 : index
    %26 = vector.load %arg5[%c0_12, %c0_13] : memref<2x32xf32, #tpu.memory_space<vmem>>, vector<2x32xf32>
    tpu.vector_store %arg5[%c0_12, %c0_13], %25 {strides = array<i32>} : memref<2x32xf32, #tpu.memory_space<vmem>>, vector<2x32xf32>,
    %c0_14 = arith.constant 0 : index
    %c0_15 = arith.constant 0 : index
    %27 = vector.load %arg6[%c0_14, %c0_15] : memref<2x32xf32, #tpu.memory_space<vmem>>, vector<2x32xf32>
    tpu.vector_store %arg6[%c0_14, %c0_15], %23 {strides = array<i32>} : memref<2x32xf32, #tpu.memory_space<vmem>>, vector<2x32xf32>,
    %cst_16 = arith.constant 0.000000e+00 : f32
    %28 = vector.broadcast %cst_16 : f32 to vector<2x32xf32>
    %29 = arith.maximumf %25, %28 : vector<2x32xf32>
    %cst_17 = arith.constant dense<0.000000e+00> : vector<2x128xf32>
    %30 = tpu.matmul %29, %3, %cst_17 {dimension_numbers = #tpu.dot_dimension_numbers<[1], [0], [0], [1], [0, 0, 1, 1], [], []>} : vector<2x32xf32>, vector<32x128xf32>, vector<2x128xf32> -> vector<2x128xf32>
    %31 = vector.broadcast %6 : vector<1x128xf32> to vector<2x128xf32>
    %32 = arith.addf %30, %31 : vector<2x128xf32>
    %cst_18 = arith.constant 0.000000e+00 : f32
    %33 = vector.broadcast %cst_18 : f32 to vector<2x128xf32>
    %34 = arith.maximumf %32, %33 : vector<2x128xf32>
    %cst_19 = arith.constant dense<0.000000e+00> : vector<2x128xf32>
    %35 = tpu.matmul %34, %4, %cst_19 {dimension_numbers = #tpu.dot_dimension_numbers<[1], [0], [0], [1], [0, 0, 1, 1], [], []>} : vector<2x128xf32>, vector<128x128xf32>, vector<2x128xf32> -> vector<2x128xf32>
    %36 = vector.broadcast %7 : vector<1x128xf32> to vector<2x128xf32>
    %37 = arith.addf %35, %36 : vector<2x128xf32>
    %c0_20 = arith.constant 0 : index
    %c0_21 = arith.constant 0 : index
    %38 = vector.load %arg4[%c0_20, %c0_21] : memref<2x128xf32, #tpu.memory_space<vmem>>, vector<2x128xf32>
    tpu.vector_store %arg4[%c0_20, %c0_21], %37 {strides = array<i32>} : memref<2x128xf32, #tpu.memory_space<vmem>>, vector<2x128xf32>,
    return
  }
}

</mosaic_0001>

<bundles_post_ra>
// kernel: tpu_custom_call.1
= control target key start
LH: loop header
LB: loop body
LE: loop exit
PB: predicated region body
PF: predicated region fallthrough
CT: control target
= control target key end

     0   :  { %12 = vsyncpa [#allocation3], 0  ;;  %s817_s0 = inlined_call_operand.hbm [shape: f32[2,48], index: 0, kind: input, shape index: {}]   ;;  %s818_s1 = inlined_call_operand.vmem [shape: f32[2,32], index: 1, kind: input, shape index: {}]   ;;  %s819_s2 = inlined_call_operand.hbm [shape: f32[208,128], index: 2, kind: input, shape index: {}]   ;;  %s820_s3 = inlined_call_operand.vmem [shape: f32[3,128], index: 3, kind: input, shape index: {}]   ;;  %s821_s4 = inlined_call_operand.hbm [shape: f32[2,128], index: 4, kind: output, shape index: {0}]   ;;  %s822_s5 = inlined_call_operand.hbm [shape: f32[2,32], index: 5, kind: output, shape index: {1}]   ;;  %s823_s6 = inlined_call_operand.hbm [shape: f32[2,32], index: 6, kind: output, shape index: {2}]  }
   0x1   :  { %13 = vsyncpa [#allocation6], 0 }
   0x2   :  { %14 = vsyncpa [#allocation4], 0 }
   0x3   :  { %15 = vsyncpa [#allocation9], 0  ;;  %s670_s21 = smov [#allocation2]   ;;  %s671_s23 = smov [#allocation5]  }
   0x4   :  { %s22_s22 = sshll.u32 %s670_s21, 4  ;;  %s33_s24 = sshll.u32 %s671_s23, 4  ;;  %s23_s22 = int_to_ptr.vmem [resolvable:$true] %s22_s22  ;;  %s718_s24 = int_to_ptr.vmem [resolvable:$true] %s33_s24 }
   0x5   :  { %s552_s27 = scalar_lea.hbm %s817_s0, 32 }
   0x6   :  { %p553_p0 = scmp.ne.s32.totalorder %s817_s0, %s552_s27  ;;  %p556_p1 = scmp.lt.u32.totalorder %s552_s27, %s817_s0 }
   0x8   :  { %p558_p2 = pnand %p556_p1, %p553_p0 }
   0xa   :  { %561 = shalt.err (!%p558_p2)
}
   0xb   :  { %s562_s8 = scalar_lea.vmem %s23_s22, 32  ;;  %p567_p4 = scmp.lt.s32.totalorder %s23_s22, %s23_s22 }
   0xc   :  { %p563_p3 = scmp.ne.s32.totalorder %s23_s22, %s562_s8  ;;  %p568_p5 = scmp.lt.s32.totalorder %s562_s8, %s562_s8 }
   0xe   :  { %p569_p6 = por %p568_p5, %p567_p4 }
  0x10   :  { %p570_p7 = pnand %p569_p6, %p563_p3 }
  0x12   :  { %573 = shalt.err (!%p570_p7)
}
  0x13   :  { %25 = dma.hbm_to_vmem [thread:$0]  %s817_s0, 32, %s23_s22, [#allocation3]  }
  0x14   :  { %s574_s13 = scalar_lea.hbm %s819_s2, 3328 }
  0x15   :  { %p575_p8 = scmp.ne.s32.totalorder %s819_s2, %s574_s13  ;;  %p578_p9 = scmp.lt.u32.totalorder %s574_s13, %s819_s2 }
  0x17   :  { %p580_p10 = pnand %p578_p9, %p575_p8 }
  0x19   :  { %583 = shalt.err (!%p580_p10)
}
  0x1a   :  { %s584_s18 = scalar_lea.vmem %s718_s24, 3328  ;;  %p589_p12 = scmp.lt.s32.totalorder %s718_s24, %s718_s24 }
  0x1b   :  { %p585_p11 = scmp.ne.s32.totalorder %s718_s24, %s584_s18  ;;  %p590_p13 = scmp.lt.s32.totalorder %s584_s18, %s584_s18 }
  0x1d   :  { %p591_p0 = por %p590_p13, %p589_p12 }
  0x1f   :  { %p592_p1 = pnand %p591_p0, %p585_p11 }
  0x21   :  { %595 = shalt.err (!%p592_p1)
}
  0x22   :  { %s672_s0 = smov 128   ;;  %s673_s19 = smov 8  }
  0x23   :  { %39 = dma.hbm_to_vmem [thread:$0]  %s819_s2, 3328, %s718_s24, [#allocation6], %s672_s0, %s672_s0, %s673_s19  }
  0x24   :  { %662 = dma.done.wait [#allocation3], 32  }
  0x25   :  { %663 = vsyncadd [#allocation3], 4294967264 }
  0x26   :  { %664 = dma.done.wait [#allocation6], 3328  }
  0x27   :  { %665 = vsyncadd [#allocation6], 4294963968  ;;  %v674_v0 = vmov 0.0|0.0   ;;  %vm675_vm0 = vmmov 0   ;;  %v676_v1 = vmov 0.0   ;;  %v50_v2 = vld [vmem:[#allocation5] sm:$0xff] }
  0x28   :  { %492 = vmatprep.subr.bf16.mxu0 %v674_v0  ;;  %443 = vmatprep.mubr.msk.f32.mxu0 %vm675_vm0, %v676_v1  ;;  %v51_v3 = vld [vmem:[#allocation5 + $0x8] sm:$0xff]  ;;  %v52_v4 = vld [vmem:[#allocation5 + $0x10] sm:$0xff]  ;;  %v53_v6 = vld [vmem:[#allocation5 + $0x18] sm:$0xff]  ;;  %vm83_vm1 = vcmask 392192   ;;  %s677_s23 = smov 64   ;;  %s678_s26 = smov 32  }
  0x29   :  { %507 = vmatprep.subr.bf16.mxu1 %v674_v0  ;;  %489 = vmatprep.mubr.msk.f32.mxu1 %vm675_vm0, %v676_v1  ;;  %v493_v5 = vpack.c.bf16 %v51_v3, %v50_v2  ;;  %v496_v7 = vpack.c.bf16 %v53_v6, %v52_v4  ;;  %v54_v8 = vld [vmem:[#allocation5 + $0x20] sm:$0xff]  ;;  %v55_v9 = vld [vmem:[#allocation5 + $0x28] sm:$0xff]  ;;  %v48_v11 = vld [vmem:[#allocation2] sm:$0x3]  ;;  %vm189_vm2 = vcmask 254976   ;;  %vm204_vm3 = vcmask 261120  }
  0x2a   :  { %v499_v10 = vpack.c.bf16 %v55_v9, %v54_v8  ;;  %v396_v12 = vld [vmem:[%s820_s3] ss:$0 sm:$0xff]  ;;  %v57_v29 = vld [vmem:[#allocation5 + $0x38] sm:$0xff]  ;;  %v58_v30 = vld [vmem:[#allocation5 + $0x40] sm:$0xff]  ;;  %s680_s29 = smov [#allocation8]  }
  0x2b   :  { %494 = vmatpush3.bf16.msra.mxu0 %v493_v5  ;;  %v49_v17 = vld [vmem:[%s818_s1] sm:$0x3]  ;;  %v59_v32 = vld [vmem:[#allocation5 + $0x48] sm:$0xff]  ;;  %v61_v36 = vld [vmem:[#allocation5 + $0x58] sm:$0xff]  ;;  %s679_s1 = smov 96   ;;  %s369_s30 = sshll.u32 %s680_s29, 4  ;;  %s370_s30 = int_to_ptr.vmem [resolvable:$true] %s369_s30 }
  0x2c   :  { %495 = vmatprep.subr.bf16.mxu0 %v674_v0  ;;  %v56_v28 = vld [vmem:[#allocation5 + $0x30] sm:$0xff]  ;;  %v505_v33 = vpack.c.bf16 %v59_v32, %v58_v30  ;;  %v62_v37 = vld [vmem:[#allocation5 + $0x60] sm:$0xff]  ;;  %v63_v39 = vld [vmem:[#allocation5 + $0x68] sm:$0xff]  ;;  %s596_s7 = scalar_lea.vmem %s370_s30, 32  ;;  %p601_p3 = scmp.lt.s32.totalorder %s370_s30, %s370_s30 }
  0x2d   :  { %v502_v31 = vpack.c.bf16 %v57_v29, %v56_v28  ;;  %v60_v35 = vld [vmem:[#allocation5 + $0x50] sm:$0xff]  ;;  %v511_v40 = vpack.c.bf16 %v63_v39, %v62_v37  ;;  %v65_v43 = vld [vmem:[#allocation5 + $0x78] sm:$0xff]  ;;  %v66_v47 = vld [vmem:[#allocation5 + $0x80] sm:$0xff]  ;;  %p597_p2 = scmp.ne.s32.totalorder %s370_s30, %s596_s7  ;;  %p602_p4 = scmp.lt.s32.totalorder %s596_s7, %s596_s7 }
  0x2e   :  { %v508_v38 = vpack.c.bf16 %v61_v36, %v60_v35  ;;  %v64_v42 = vld [vmem:[#allocation5 + $0x70] sm:$0xff]  ;;  %v67_v48 = vld [vmem:[#allocation5 + $0x88] sm:$0xff]  ;;  %v69_v51 = vld [vmem:[#allocation5 + $0x98] sm:$0xff] }
  0x2f   :  { %497 = vmatpush3.bf16.msra.mxu0 %v496_v7  ;;  %v514_v46 = vpack.c.bf16 %v65_v43, %v64_v42  ;;  %v517_v49 = vpack.c.bf16 %v67_v48, %v66_v47  ;;  %v68_v50 = vld [vmem:[#allocation5 + $0x90] sm:$0xff]  ;;  %v70_v53 = vld [vmem:[#allocation5 + $0xa0] sm:$0xff]  ;;  %v71_v54 = vld [vmem:[#allocation5 + $0xa8] sm:$0xff]  ;;  %p603_p5 = por %p602_p4, %p601_p3 }
  0x30   :  { %498 = vmatprep.subr.bf16.mxu0 %v674_v0  ;;  %509 = vmatpush3.bf16.msra.mxu1 %v508_v38  ;;  %v520_v52 = vpack.c.bf16 %v69_v51, %v68_v50  ;;  %v523_v55 = vpack.c.bf16 %v71_v54, %v70_v53  ;;  %v72_v56 = vld [vmem:[#allocation5 + $0xb0] sm:$0xff]  ;;  %v73_v57 = vld [vmem:[#allocation5 + $0xb8] sm:$0xff]  ;;  %v74_v62 = vld [vmem:[#allocation5 + $0xc0] sm:$0xff] }
  0x31   :  { %510 = vmatprep.subr.bf16.mxu1 %v674_v0  ;;  %v526_v58 = vpack.c.bf16 %v73_v57, %v72_v56  ;;  %v75_v63 = vld [vmem:[#allocation5 + $0xc8] sm:$0xff]  ;;  %v399_v2 = vld [vmem:[%s820_s3 + $0x1] ss:$0 sm:$0xff]  ;;  %p604_p6 = pnand %p603_p5, %p597_p2 }
  0x33   :  { %500 = vmatpush3.bf16.msra.mxu0 %v499_v10 }
  0x34   :  { %501 = vmatprep.subr.bf16.mxu0 %v674_v0  ;;  %512 = vmatpush3.bf16.msra.mxu1 %v511_v40 }
  0x35   :  { %513 = vmatprep.subr.bf16.mxu1 %v674_v0 }
  0x36   :  { %444 = vmatmul.mubr.msk.f32.vlgmr.msra.gmra.mrb[0].mxu0 %vm83_vm1, %v48_v11 }
  0x37   :  { %454 = vmatprep.mubr.msk.f32.mxu0 %vm675_vm0, %v676_v1  ;;  %503 = vmatpush3.bf16.msra.mxu0 %v502_v31  ;;  %v529_v1 = vpack.c.bf16 %v75_v63, %v74_v62 }
  0x38   :  { %504 = vmatprep.subr.bf16.mxu0 %v674_v0  ;;  %515 = vmatpush3.bf16.msra.mxu1 %v514_v46 }
  0x39   :  { %516 = vmatprep.subr.bf16.mxu1 %v674_v0 }
  0x3b   :  { %506 = vmatpush3.bf16.msra.mxu0 %v505_v33 }
  0x3c   :  { %518 = vmatpush3.bf16.msra.mxu1 %v517_v49 }
  0x3d   :  { %519 = vmatprep.subr.bf16.mxu1 %v674_v0 }
  0x40   :  { %521 = vmatpush3.bf16.msra.mxu1 %v520_v52 }
  0x41   :  { %522 = vmatprep.subr.bf16.mxu1 %v674_v0 }
  0x44   :  { %524 = vmatpush3.bf16.msra.mxu1 %v523_v55 }
  0x45   :  { %525 = vmatprep.subr.bf16.mxu1 %v674_v0 }
  0x48   :  { %527 = vmatpush3.bf16.msra.mxu1 %v526_v58 }
  0x49   :  { %528 = vmatprep.subr.bf16.mxu1 %v674_v0 }
  0x4c   :  { %530 = vmatpush3.bf16.msra.mxu1 %v529_v1 }
 0x109   :  { %v153_v13 = vpop.f32.mrb[0].mxu0 }
 0x10a   :  { %v154_v14 = vadd.f32 %v396_v12, %v153_v13  ;;  %v445_v15 = vpop.f32.mrb[1].mxu0 }
 0x10c   :  { %544 = vtanh.f32 %v154_v14  ;;  %v398_v18 = vmul.f32 -1.442695, %v154_v14 }
 0x10e   :  { %546 = vpow2.f32 %v398_v18 }
 0x116   :  { %v545_v16 = vpop.eup %544 }
 0x117   :  { %170 = vrot.lane.b32.xlu0 %v545_v16, %s677_s23 }
 0x118   :  { %v547_v19 = vpop.eup %546 }
 0x119   :  { %v160_v20 = vadd.f32 1.0, %v547_v19 }
 0x11b   :  { %165 = vrot.lane.b32.xlu0 %v49_v17, %s678_s26  ;;  %548 = vrcp.f32 %v160_v20 }
 0x125   :  { %v549_v21 = vpop.eup %548 }
 0x189   :  { %v171_v22 = vpop.permute.xlu0 %170 }
 0x18a   :  { %v173_v23 = vmul.f32 %v549_v21, %v171_v22 }
 0x18c   :  { %175 = vrot.lane.b32.xlu1 %v173_v23, %s678_s26 }
 0x18d   :  { %v166_v24 = vpop.permute.xlu0 %165 }
 0x18e   :  { %v168_v25 = vmul.f32 %v549_v21, %v166_v24 }
 0x1fe   :  { %v176_v26 = vpop.permute.xlu1 %175 }
 0x1ff   :  { %v178_v27 = vadd.f32 %v176_v26, %v168_v25 }
 0x201   :  { %550 = vtanh.f32 %v178_v27 }
 0x20b   :  { %v551_v34 = vpop.eup %550 }
 0x20c   :  { %181 = vrot.lane.b32.xlu1 %v551_v34, %s677_s23 }
 0x27e   :  { %v182_v41 = vpop.permute.xlu1 %181 }
 0x27f   :  { %v184_v44 = vmul.f32 %v549_v21, %v182_v41 }
 0x281   :  { %v196_v45 = vmax.f32 %v184_v44, 0.0  ;;  %186 = vrot.lane.b32.xlu1 %v184_v44, %s678_s26 }
 0x283   :  { %202 = vrot.lane.b32.xlu0 %v196_v45, %s678_s26 }
 0x287   :  { %192 = vrot.lane.b32.xlu0 %v178_v27, %s679_s1 }
 0x2f3   :  { %v187_v59 = vpop.permute.xlu1 %186 }
 0x2f4   :  { %190 = vst.msk [vmem:[#allocation8] sm:$0x3] %vm189_vm2, %v187_v59 }
 0x2f5   :  { %v203_v60 = vpop.permute.xlu0 %202 }
 0x2f6   :  { %455 = vmatmul.mubr.msk.f32.vlgmr.msra.gmra.mrb[2].mxu0 %vm204_vm3, %v203_v60 }
 0x2f9   :  { %v193_v61 = vpop.permute.xlu0 %192 }
 0x2fa   :  { %195 = vst.msk [vmem:[#allocation10] sm:$0x3] %vm189_vm2, %v193_v61 }
 0x3c9   :  { %v273_v3 = vpop.f32.mrb[2].mxu0 }
 0x3ca   :  { %v274_v4 = vadd.f32 %v399_v2, %v273_v3  ;;  %v456_v5 = vpop.f32.mrb[3].mxu0 }
 0x3cc   :  { %v277_v0 = vmax.f32 %v274_v4, 0.0 }
 0x3ce   :  { %490 = vmatmul.mubr.f32.vlgmr.msra.gmra.mrb[0].mxu1 %v277_v0 }
 0x3cf   :  { %607 = shalt.err (!%p604_p6)
}
 0x3d0   :  { %s608_s10 = scalar_lea.hbm %s822_s5, 32 }
 0x3d1   :  { %p609_p7 = scmp.ne.s32.totalorder %s822_s5, %s608_s10  ;;  %p612_p8 = scmp.lt.u32.totalorder %s608_s10, %s822_s5 }
 0x3d3   :  { %p614_p9 = pnand %p612_p8, %p609_p7 }
 0x3d5   :  { %617 = shalt.err (!%p614_p9)
}
 0x3d6   :  { %372 = dma.vmem_to_hbm [thread:$0]  %s370_s30, 32, %s822_s5, [#allocation9]  }
 0x3d7   :  { %s681_s17 = smov [#allocation10]  }
 0x3d8   :  { %s379_s18 = sshll.u32 %s681_s17, 4  ;;  %s380_s18 = int_to_ptr.vmem [resolvable:$true] %s379_s18 }
 0x3d9   :  { %s618_s0 = scalar_lea.vmem %s380_s18, 32  ;;  %p623_p11 = scmp.lt.s32.totalorder %s380_s18, %s380_s18 }
 0x3da   :  { %p619_p10 = scmp.ne.s32.totalorder %s380_s18, %s618_s0  ;;  %p624_p12 = scmp.lt.s32.totalorder %s618_s0, %s618_s0 }
 0x3dc   :  { %p625_p13 = por %p624_p12, %p623_p11 }
 0x3de   :  { %p626_p0 = pnand %p625_p13, %p619_p10 }
 0x3e0   :  { %629 = shalt.err (!%p626_p0)
}
 0x3e1   :  { %s630_s21 = scalar_lea.hbm %s823_s6, 32 }
 0x3e2   :  { %p631_p1 = scmp.ne.s32.totalorder %s823_s6, %s630_s21  ;;  %p634_p2 = scmp.lt.u32.totalorder %s630_s21, %s823_s6 }
 0x3e4   :  { %p636_p3 = pnand %p634_p2, %p631_p1 }
 0x3e6   :  { %639 = shalt.err (!%p636_p3)
}
 0x3e7   :  { %382 = dma.vmem_to_hbm [thread:$0]  %s380_s18, 32, %s823_s6, [#allocation9]   ;;  %v401_v6 = vld [vmem:[%s820_s3 + $0x2] ss:$0 sm:$0xff] }
 0x3e8   :  { %s682_s27 = smov [#allocation7]  }
 0x3e9   :  { %s359_s28 = sshll.u32 %s682_s27, 4  ;;  %s360_s28 = int_to_ptr.vmem [resolvable:$true] %s359_s28 }
 0x3ea   :  { %s640_s29 = scalar_lea.vmem %s360_s28, 32  ;;  %p645_p5 = scmp.lt.s32.totalorder %s360_s28, %s360_s28 }
 0x3eb   :  { %p641_p4 = scmp.ne.s32.totalorder %s360_s28, %s640_s29  ;;  %p646_p6 = scmp.lt.s32.totalorder %s640_s29, %s640_s29 }
 0x3ed   :  { %p647_p7 = por %p646_p6, %p645_p5 }
 0x3ef   :  { %p648_p8 = pnand %p647_p7, %p641_p4 }
 0x4a1   :  { %v348_v7 = vpop.f32.mrb[0].mxu1 }
 0x4a2   :  { %v349_v8 = vadd.f32 %v401_v6, %v348_v7  ;;  %v491_v9 = vpop.f32.mrb[1].mxu1 }
 0x4a4   :  { %352 = vst [vmem:[#allocation7] sm:$0x3] %v349_v8 }
 0x4a5   :  { %651 = shalt.err (!%p648_p8)
}
 0x4a6   :  { %s652_s7 = scalar_lea.hbm %s821_s4, 32 }
 0x4a7   :  { %p653_p9 = scmp.ne.s32.totalorder %s821_s4, %s652_s7  ;;  %p656_p10 = scmp.lt.u32.totalorder %s652_s7, %s821_s4 }
 0x4a9   :  { %p658_p11 = pnand %p656_p10, %p653_p9 }
 0x4ab   :  { %661 = shalt.err (!%p658_p11)
}
 0x4ac   :  { %362 = dma.vmem_to_hbm [thread:$0]  %s360_s28, 32, %s821_s4, [#allocation4]  }
 0x4ad   :  { %666 = dma.done.wait [#allocation4], 32  }
 0x4ae   :  { %667 = vsyncadd [#allocation4], 4294967264 }
 0x4af   :  { %668 = dma.done.wait [#allocation9], 64  }
 0x4b0   :  { %669 = vsyncadd [#allocation9], 4294967232 }
 0x4b1   :  { %392 = vsyncpa [#allocation3], 1 }
 0x4b2   :  { %393 = vsyncpa [#allocation6], 1 }
 0x4b3   :  { %394 = vsyncpa [#allocation4], 1 }
 0x4b4   :  { %395 = vsyncpa [#allocation9], 1 }

</bundles_post_ra>
